<compile_context>
chip_gen: v7x
topology: tpu7x:2x2x1
jax: 0.10.0
libtpu: 0.0.40
codegen_flags: <defaults>
</compile_context>

<pallas_src>
import math

import jax
import jax.numpy as jnp
from jax.experimental import pallas as pl
from jax.experimental.pallas import tpu as pltpu


def make_pe_table(d_model: int, max_len: int = 5000, dtype=jnp.float32):
    """Deterministic sinusoidal table, shape (max_len, 1, d_model)."""
    position = jnp.arange(max_len, dtype=jnp.float32)[:, None]                 # (L, 1)
    div_term = jnp.exp(
        jnp.arange(0, d_model, 2, dtype=jnp.float32) * (-math.log(10000.0) / d_model)
    )                                                                          # (ceil(D/2),)
    angles = position * div_term                                               # (L, ceil(D/2))
    pe = jnp.zeros((max_len, d_model), jnp.float32)
    pe = pe.at[:, 0::2].set(jnp.sin(angles))
    pe = pe.at[:, 1::2].set(jnp.cos(angles[:, : d_model // 2]))
    return pe[:, None, :].astype(dtype)                                        # (L, 1, D)


def _vmem_capacity_bytes() -> int:
    """Per-core VMEM capacity; conservative fallback = v7x (64 MiB)."""
    try:
        return int(pltpu.get_tpu_info().vmem_capacity_bytes)
    except Exception:
        return 64 << 20


def _single_buffered_spec(block_shape, index_map):
    """Constant-index_map operand -> request 1 pipeline buffer (saves VMEM)."""
    try:
        spec = pl.BlockSpec(block_shape, index_map, pipeline_mode=pl.Buffered(1))
        return spec, 1
    except TypeError:
        return pl.BlockSpec(block_shape, index_map), 2


def _choose_seq_tile(S: int, B: int, D: int, itemsize: int,
                     target_bytes: int, min_grid: int) -> int:
    """Largest divisor of S giving a sublane-aligned streamed tile under budget.

    Prefers a grid of >= min_grid steps (software pipelining + both v7x TCs),
    then >= 2, then anything valid."""
    def tile_bytes(t):
        return 2 * t * B * D * itemsize        # double-buffered output tile
    divisors = [t for t in range(1, S + 1) if S % t == 0]
    valid = [t for t in divisors if (t * B) % 8 == 0 or t == S]
    for min_steps in (min_grid, 2, 1):
        cands = [t for t in valid
                 if S // t >= min_steps and tile_bytes(t) <= target_bytes]
        if cands:
            return max(cands)
    return min(valid, key=tile_bytes)          # nothing under budget: smallest


def input_embedding(token_ids: jax.Array, emb_table: jax.Array, pe: jax.Array,
                    *, seq_tile: int | None = None) -> jax.Array:
    """token_ids: (S, B) int; emb_table: (V, D); pe: (max_len, 1, D).

    Returns emb_table[token_ids] + pe[:S], shape (S, B, D), dtype emb_table.dtype."""
    S, B = token_ids.shape
    V, D = emb_table.shape
    out_dtype = emb_table.dtype
    itemsize = jnp.dtype(out_dtype).itemsize

    pe2 = pe[:S, 0, :].astype(out_dtype)                       # (S, D), resident
    ids_flat = token_ids.astype(jnp.int32).reshape(S * B)      # row r = s*B + b (SMEM)

    vmem_cap = int(_vmem_capacity_bytes() * 0.85)              # leave compiler headroom

    # Resident operands: table (V, D) and PE slice (S, D), constant index_map.
    emb_spec, emb_bufs = _single_buffered_spec((V, D), lambda i, ids: (0, 0))
    pe_spec, pe_bufs = _single_buffered_spec((S, D), lambda i, ids: (0, 0))
    resident_bytes = emb_bufs * V * D * itemsize + pe_bufs * S * D * itemsize

    headroom = 2 << 20
    stream_budget = max(1 << 20, vmem_cap - resident_bytes - headroom)
    target_tile = max(64 << 10, min(8 << 20, stream_budget // 2))

    if seq_tile is None:
        seq_tile = _choose_seq_tile(S, B, D, itemsize, target_tile, min_grid=4)
    assert S % seq_tile == 0
    rows = seq_tile * B
    assert rows % 8 == 0 or seq_tile == S
    nseq = S // seq_tile

    def kernel(ids_ref, emb_ref, pe_ref, o_ref):
        i = pl.program_id(0)
        base_row = i * rows          # first flat output row of this block
        base_seq = i * seq_tile      # first sequence position of this block

        def seq_body(sl, carry):
            pe_row = pe_ref[pl.ds(base_seq + sl, 1), :]                 # (1, D)
            r0 = sl * B
            for b in range(B):                                          # static unroll
                # nn.Embedding raises on out-of-range ids; we clamp instead
                # (documented deviation) to avoid OOB VMEM reads.
                tok = jnp.clip(ids_ref[base_row + r0 + b], 0, V - 1)    # SMEM scalar
                o_ref[pl.ds(r0 + b, 1), :] = (
                    emb_ref[pl.ds(tok, 1), :] + pe_row                  # exact VPU add
                )
            return carry

        try:
            jax.lax.fori_loop(0, seq_tile, seq_body, 0, unroll=4)
        except TypeError:            # older jax without fori_loop unroll kwarg
            jax.lax.fori_loop(0, seq_tile, seq_body, 0)

    est_vmem = resident_bytes + 2 * rows * D * itemsize + headroom
    vmem_limit = int(min(vmem_cap, max(16 << 20, est_vmem)))

    out2 = pl.pallas_call(
        kernel,
        out_shape=jax.ShapeDtypeStruct((S * B, D), out_dtype),
        grid_spec=pltpu.PrefetchScalarGridSpec(
            num_scalar_prefetch=1,               # ids -> SMEM, visible to index_maps
            grid=(nseq,),
            in_specs=[emb_spec, pe_spec],        # both resident (constant index_map)
            out_specs=pl.BlockSpec((rows, D), lambda i, ids: (i, 0)),
        ),
        compiler_params=pltpu.CompilerParams(
            dimension_semantics=("parallel",),
            vmem_limit_bytes=vmem_limit,
        ),
    )(ids_flat, emb_table, pe2)

    return out2.reshape(S, B, D)                 # free: row-major metadata reshape


if __name__ == "__main__":
    # Small shapes consistent with the module: tokens (S, B) -> output (S, B, D).
    S, B, D, V = 16, 2, 128, 256
    MAX_LEN = 64   # semantics identical to max_len=5000 for S <= 64

    key = jax.random.PRNGKey(0)
    k_ids, k_emb = jax.random.split(key)
    token_ids = jax.random.randint(k_ids, (S, B), 0, V, dtype=jnp.int32)
    emb_table = 0.02 * jax.random.normal(k_emb, (V, D), dtype=jnp.float32)
    pe = make_pe_table(D, max_len=MAX_LEN, dtype=jnp.float32)

    out = input_embedding(token_ids, emb_table, pe)
    out = jax.block_until_ready(out)

    # Reference in plain JAX: gather + broadcasted pe add.
    ref = jnp.take(emb_table, token_ids, axis=0) + pe[:S]     # (S, B, D)
    assert out.shape == (S, B, D) and out.dtype == emb_table.dtype
    max_err = float(jnp.max(jnp.abs(out - ref)))
    # The kernel now does a true gather + exact f32 VPU add -> should match bitwise.
    assert max_err <= 1e-6, f"max abs error {max_err}"
    print("KERNEL_OK")
</pallas_src>

<mosaic_0001>
module attributes {stable_mosaic.version = 11 : i64} {
  func.func @kernel(%arg0: i32, %arg1: memref<32xi32, #tpu.memory_space<smem>>, %arg2: memref<256x128xf32, #tpu.memory_space<vmem>>, %arg3: memref<16x128xf32, #tpu.memory_space<vmem>>, %arg4: memref<8x128xf32, #tpu.memory_space<vmem>>) attributes {dimension_semantics = [#tpu.dimension_semantics<parallel>], iteration_bounds = array<i64: 4>, scalar_prefetch = 1 : i64, scratch_operands = 0 : i64, tpu.core_type = #tpu.core_type<tc>, window_params = [{pipeline_mode = #tpu.pipeline_mode<synchronous>, transform_indices = @transform_0, window_bounds = array<i64: 256, 128>}, {pipeline_mode = #tpu.pipeline_mode<synchronous>, transform_indices = @transform_1, window_bounds = array<i64: 16, 128>}, {transform_indices = @transform_2, window_bounds = array<i64: 8, 128>}]} {
    %c8_i32 = arith.constant 8 : i32
    %0 = arith.muli %arg0, %c8_i32 : i32
    %c4_i32 = arith.constant 4 : i32
    %1 = arith.muli %arg0, %c4_i32 : i32
    %c0_i32 = arith.constant 0 : i32
    %2 = arith.addi %1, %c0_i32 : i32
    %3 = arith.index_cast %2 : i32 to index
    %c0 = arith.constant 0 : index
    %4 = vector.load %arg3[%3, %c0] : memref<16x128xf32, #tpu.memory_space<vmem>>, vector<1x128xf32>
    %c2_i32 = arith.constant 2 : i32
    %5 = arith.muli %c0_i32, %c2_i32 : i32
    %6 = arith.addi %0, %5 : i32
    %c0_i32_0 = arith.constant 0 : i32
    %7 = arith.addi %6, %c0_i32_0 : i32
    %8 = arith.index_cast %7 : i32 to index
    %9 = memref.load %arg1[%8] : memref<32xi32, #tpu.memory_space<smem>>
    %c0_i32_1 = arith.constant 0 : i32
    %c255_i32 = arith.constant 255 : i32
    %10 = arith.maxsi %c0_i32_1, %9 : i32
    %11 = arith.minsi %c255_i32, %10 : i32
    %12 = arith.index_cast %11 : i32 to index
    %c0_2 = arith.constant 0 : index
    %13 = vector.load %arg2[%12, %c0_2] : memref<256x128xf32, #tpu.memory_space<vmem>>, vector<1x128xf32>
    %14 = arith.addf %13, %4 : vector<1x128xf32>
    %c0_i32_3 = arith.constant 0 : i32
    %15 = arith.addi %5, %c0_i32_3 : i32
    %16 = arith.index_cast %15 : i32 to index
    %c0_4 = arith.constant 0 : index
    %17 = vector.load %arg4[%16, %c0_4] : memref<8x128xf32, #tpu.memory_space<vmem>>, vector<1x128xf32>
    tpu.vector_store %arg4[%16, %c0_4], %14 {strides = array<i32>} : memref<8x128xf32, #tpu.memory_space<vmem>>, vector<1x128xf32>,
    %18 = arith.addi %0, %5 : i32
    %c1_i32 = arith.constant 1 : i32
    %19 = arith.addi %18, %c1_i32 : i32
    %20 = arith.index_cast %19 : i32 to index
    %21 = memref.load %arg1[%20] : memref<32xi32, #tpu.memory_space<smem>>
    %c0_i32_5 = arith.constant 0 : i32
    %c255_i32_6 = arith.constant 255 : i32
    %22 = arith.maxsi %c0_i32_5, %21 : i32
    %23 = arith.minsi %c255_i32_6, %22 : i32
    %24 = arith.index_cast %23 : i32 to index
    %c0_7 = arith.constant 0 : index
    %25 = vector.load %arg2[%24, %c0_7] : memref<256x128xf32, #tpu.memory_space<vmem>>, vector<1x128xf32>
    %26 = arith.addf %25, %4 : vector<1x128xf32>
    %c1_i32_8 = arith.constant 1 : i32
    %27 = arith.addi %5, %c1_i32_8 : i32
    %28 = arith.index_cast %27 : i32 to index
    %c0_9 = arith.constant 0 : index
    %29 = vector.load %arg4[%28, %c0_9] : memref<8x128xf32, #tpu.memory_space<vmem>>, vector<1x128xf32>
    tpu.vector_store %arg4[%28, %c0_9], %26 {strides = array<i32>} : memref<8x128xf32, #tpu.memory_space<vmem>>, vector<1x128xf32>,
    %c1_i32_10 = arith.constant 1 : i32
    %30 = arith.addi %1, %c1_i32_10 : i32
    %31 = arith.index_cast %30 : i32 to index
    %c0_11 = arith.constant 0 : index
    %32 = vector.load %arg3[%31, %c0_11] : memref<16x128xf32, #tpu.memory_space<vmem>>, vector<1x128xf32>
    %c2_i32_12 = arith.constant 2 : i32
    %33 = arith.muli %c1_i32_10, %c2_i32_12 : i32
    %34 = arith.addi %0, %33 : i32
    %c0_i32_13 = arith.constant 0 : i32
    %35 = arith.addi %34, %c0_i32_13 : i32
    %36 = arith.index_cast %35 : i32 to index
    %37 = memref.load %arg1[%36] : memref<32xi32, #tpu.memory_space<smem>>
    %c0_i32_14 = arith.constant 0 : i32
    %c255_i32_15 = arith.constant 255 : i32
    %38 = arith.maxsi %c0_i32_14, %37 : i32
    %39 = arith.minsi %c255_i32_15, %38 : i32
    %40 = arith.index_cast %39 : i32 to index
    %c0_16 = arith.constant 0 : index
    %41 = vector.load %arg2[%40, %c0_16] : memref<256x128xf32, #tpu.memory_space<vmem>>, vector<1x128xf32>
    %42 = arith.addf %41, %32 : vector<1x128xf32>
    %c0_i32_17 = arith.constant 0 : i32
    %43 = arith.addi %33, %c0_i32_17 : i32
    %44 = arith.index_cast %43 : i32 to index
    %c0_18 = arith.constant 0 : index
    %45 = vector.load %arg4[%44, %c0_18] : memref<8x128xf32, #tpu.memory_space<vmem>>, vector<1x128xf32>
    tpu.vector_store %arg4[%44, %c0_18], %42 {strides = array<i32>} : memref<8x128xf32, #tpu.memory_space<vmem>>, vector<1x128xf32>,
    %46 = arith.addi %0, %33 : i32
    %c1_i32_19 = arith.constant 1 : i32
    %47 = arith.addi %46, %c1_i32_19 : i32
    %48 = arith.index_cast %47 : i32 to index
    %49 = memref.load %arg1[%48] : memref<32xi32, #tpu.memory_space<smem>>
    %c0_i32_20 = arith.constant 0 : i32
    %c255_i32_21 = arith.constant 255 : i32
    %50 = arith.maxsi %c0_i32_20, %49 : i32
    %51 = arith.minsi %c255_i32_21, %50 : i32
    %52 = arith.index_cast %51 : i32 to index
    %c0_22 = arith.constant 0 : index
    %53 = vector.load %arg2[%52, %c0_22] : memref<256x128xf32, #tpu.memory_space<vmem>>, vector<1x128xf32>
    %54 = arith.addf %53, %32 : vector<1x128xf32>
    %c1_i32_23 = arith.constant 1 : i32
    %55 = arith.addi %33, %c1_i32_23 : i32
    %56 = arith.index_cast %55 : i32 to index
    %c0_24 = arith.constant 0 : index
    %57 = vector.load %arg4[%56, %c0_24] : memref<8x128xf32, #tpu.memory_space<vmem>>, vector<1x128xf32>
    tpu.vector_store %arg4[%56, %c0_24], %54 {strides = array<i32>} : memref<8x128xf32, #tpu.memory_space<vmem>>, vector<1x128xf32>,
    %c2_i32_25 = arith.constant 2 : i32
    %58 = arith.addi %1, %c2_i32_25 : i32
    %59 = arith.index_cast %58 : i32 to index
    %c0_26 = arith.constant 0 : index
    %60 = vector.load %arg3[%59, %c0_26] : memref<16x128xf32, #tpu.memory_space<vmem>>, vector<1x128xf32>
    %c2_i32_27 = arith.constant 2 : i32
    %61 = arith.muli %c2_i32_25, %c2_i32_27 : i32
    %62 = arith.addi %0, %61 : i32
    %c0_i32_28 = arith.constant 0 : i32
    %63 = arith.addi %62, %c0_i32_28 : i32
    %64 = arith.index_cast %63 : i32 to index
    %65 = memref.load %arg1[%64] : memref<32xi32, #tpu.memory_space<smem>>
    %c0_i32_29 = arith.constant 0 : i32
    %c255_i32_30 = arith.constant 255 : i32
    %66 = arith.maxsi %c0_i32_29, %65 : i32
    %67 = arith.minsi %c255_i32_30, %66 : i32
    %68 = arith.index_cast %67 : i32 to index
    %c0_31 = arith.constant 0 : index
    %69 = vector.load %arg2[%68, %c0_31] : memref<256x128xf32, #tpu.memory_space<vmem>>, vector<1x128xf32>
    %70 = arith.addf %69, %60 : vector<1x128xf32>
    %c0_i32_32 = arith.constant 0 : i32
    %71 = arith.addi %61, %c0_i32_32 : i32
    %72 = arith.index_cast %71 : i32 to index
    %c0_33 = arith.constant 0 : index
    %73 = vector.load %arg4[%72, %c0_33] : memref<8x128xf32, #tpu.memory_space<vmem>>, vector<1x128xf32>
    tpu.vector_store %arg4[%72, %c0_33], %70 {strides = array<i32>} : memref<8x128xf32, #tpu.memory_space<vmem>>, vector<1x128xf32>,
    %74 = arith.addi %0, %61 : i32
    %c1_i32_34 = arith.constant 1 : i32
    %75 = arith.addi %74, %c1_i32_34 : i32
    %76 = arith.index_cast %75 : i32 to index
    %77 = memref.load %arg1[%76] : memref<32xi32, #tpu.memory_space<smem>>
    %c0_i32_35 = arith.constant 0 : i32
    %c255_i32_36 = arith.constant 255 : i32
    %78 = arith.maxsi %c0_i32_35, %77 : i32
    %79 = arith.minsi %c255_i32_36, %78 : i32
    %80 = arith.index_cast %79 : i32 to index
    %c0_37 = arith.constant 0 : index
    %81 = vector.load %arg2[%80, %c0_37] : memref<256x128xf32, #tpu.memory_space<vmem>>, vector<1x128xf32>
    %82 = arith.addf %81, %60 : vector<1x128xf32>
    %c1_i32_38 = arith.constant 1 : i32
    %83 = arith.addi %61, %c1_i32_38 : i32
    %84 = arith.index_cast %83 : i32 to index
    %c0_39 = arith.constant 0 : index
    %85 = vector.load %arg4[%84, %c0_39] : memref<8x128xf32, #tpu.memory_space<vmem>>, vector<1x128xf32>
    tpu.vector_store %arg4[%84, %c0_39], %82 {strides = array<i32>} : memref<8x128xf32, #tpu.memory_space<vmem>>, vector<1x128xf32>,
    %c3_i32 = arith.constant 3 : i32
    %86 = arith.addi %1, %c3_i32 : i32
    %87 = arith.index_cast %86 : i32 to index
    %c0_40 = arith.constant 0 : index
    %88 = vector.load %arg3[%87, %c0_40] : memref<16x128xf32, #tpu.memory_space<vmem>>, vector<1x128xf32>
    %c2_i32_41 = arith.constant 2 : i32
    %89 = arith.muli %c3_i32, %c2_i32_41 : i32
    %90 = arith.addi %0, %89 : i32
    %c0_i32_42 = arith.constant 0 : i32
    %91 = arith.addi %90, %c0_i32_42 : i32
    %92 = arith.index_cast %91 : i32 to index
    %93 = memref.load %arg1[%92] : memref<32xi32, #tpu.memory_space<smem>>
    %c0_i32_43 = arith.constant 0 : i32
    %c255_i32_44 = arith.constant 255 : i32
    %94 = arith.maxsi %c0_i32_43, %93 : i32
    %95 = arith.minsi %c255_i32_44, %94 : i32
    %96 = arith.index_cast %95 : i32 to index
    %c0_45 = arith.constant 0 : index
    %97 = vector.load %arg2[%96, %c0_45] : memref<256x128xf32, #tpu.memory_space<vmem>>, vector<1x128xf32>
    %98 = arith.addf %97, %88 : vector<1x128xf32>
    %c0_i32_46 = arith.constant 0 : i32
    %99 = arith.addi %89, %c0_i32_46 : i32
    %100 = arith.index_cast %99 : i32 to index
    %c0_47 = arith.constant 0 : index
    %101 = vector.load %arg4[%100, %c0_47] : memref<8x128xf32, #tpu.memory_space<vmem>>, vector<1x128xf32>
    tpu.vector_store %arg4[%100, %c0_47], %98 {strides = array<i32>} : memref<8x128xf32, #tpu.memory_space<vmem>>, vector<1x128xf32>,
    %102 = arith.addi %0, %89 : i32
    %c1_i32_48 = arith.constant 1 : i32
    %103 = arith.addi %102, %c1_i32_48 : i32
    %104 = arith.index_cast %103 : i32 to index
    %105 = memref.load %arg1[%104] : memref<32xi32, #tpu.memory_space<smem>>
    %c0_i32_49 = arith.constant 0 : i32
    %c255_i32_50 = arith.constant 255 : i32
    %106 = arith.maxsi %c0_i32_49, %105 : i32
    %107 = arith.minsi %c255_i32_50, %106 : i32
    %108 = arith.index_cast %107 : i32 to index
    %c0_51 = arith.constant 0 : index
    %109 = vector.load %arg2[%108, %c0_51] : memref<256x128xf32, #tpu.memory_space<vmem>>, vector<1x128xf32>
    %110 = arith.addf %109, %88 : vector<1x128xf32>
    %c1_i32_52 = arith.constant 1 : i32
    %111 = arith.addi %89, %c1_i32_52 : i32
    %112 = arith.index_cast %111 : i32 to index
    %c0_53 = arith.constant 0 : index
    %113 = vector.load %arg4[%112, %c0_53] : memref<8x128xf32, #tpu.memory_space<vmem>>, vector<1x128xf32>
    tpu.vector_store %arg4[%112, %c0_53], %110 {strides = array<i32>} : memref<8x128xf32, #tpu.memory_space<vmem>>, vector<1x128xf32>,
    %c4_i32_54 = arith.constant 4 : i32
    return
  }
  func.func @transform_0(%arg0: i32, %arg1: memref<32xi32, #tpu.memory_space<smem>>) -> (i32, i32) {
    %c0_i32 = arith.constant 0 : i32
    %c0_i32_0 = arith.constant 0 : i32
    %c0_i32_1 = arith.constant 0 : i32
    return %c0_i32, %c0_i32_0 : i32, i32
  }
  func.func @transform_1(%arg0: i32, %arg1: memref<32xi32, #tpu.memory_space<smem>>) -> (i32, i32) {
    %c0_i32 = arith.constant 0 : i32
    %c0_i32_0 = arith.constant 0 : i32
    %c0_i32_1 = arith.constant 0 : i32
    return %c0_i32, %c0_i32_0 : i32, i32
  }
  func.func @transform_2(%arg0: i32, %arg1: memref<32xi32, #tpu.memory_space<smem>>) -> (i32, i32) {
    %c0_i32 = arith.constant 0 : i32
    %c0_i32_0 = arith.constant 0 : i32
    return %arg0, %c0_i32 : i32, i32
  }
}

</mosaic_0001>

<bundles_post_ra>
// kernel: tpu_custom_call.1
= control target key start
LH: loop header
LB: loop body
LE: loop exit
PB: predicated region body
PF: predicated region fallthrough
CT: control target
= control target key end

     0   :  { %s896_s0 = inlined_call_operand.hbm [shape: s32[32], index: 0, kind: input, shape index: {}]   ;;  %s897_s1 = inlined_call_operand.hbm [shape: f32[256,128], index: 1, kind: input, shape index: {}]   ;;  %s898_s2 = inlined_call_operand.hbm [shape: f32[16,128], index: 2, kind: input, shape index: {}]   ;;  %s899_s3 = inlined_call_operand.hbm [shape: f32[32,128], index: 3, kind: output, shape index: {}]  }
   0x1   :  { %s490_s14 = scalar_lea.hbm %s896_s0, 16 }
   0x2   :  { %p491_p0 = scmp.ne.s32.totalorder %s896_s0, %s490_s14  ;;  %p494_p1 = scmp.lt.u32.totalorder %s490_s14, %s896_s0 }
   0x4   :  { %p496_p2 = pnand %p494_p1, %p491_p0 }
   0x6   :  { %499 = shalt.err (!%p496_p2)  }
   0x7   :  { %s630_s19 = smov [#allocation3]  }
   0x8   :  { %9 = dma.hbm_to_smem %s896_s0, 16, %s630_s19, [#allocation2] }
   0x9   :  { %600 = dma.done.wait [#allocation2], 16 }
   0xa   :  { %601 = vsyncadd [#allocation2], 4294967280 }
   0xb   :  { %11 = sfence }
   0xc   :  { %12 = vsyncpa [#allocation5], 0 }
   0xd   :  { %13 = vsyncpa [#allocation8], 0 }
   0xe   :  { %14 = vsyncpa [#allocation6], 0 }
   0xf   :  { %16 = vsyncpa [#allocation6 + $0x1], 0  ;;  %s668_s22 = smov 0   ;;  %s670_s23 = smov 0  }
  0x10   :  { %s672_s24 = smov 0   ;;  %s674_s25 = smov 0  }
  0x11 LB: > { %s689_s0 = sadd.s32 4294967295, %s628_s25   ;;  %s351_s26 = sadd.s32 4294967294, %s628_s25   ;;  %s628_s25 = sphi %s674_s25, %s917_s25   ;;  %s624_s24 = sphi %s672_s24, %s916_s24   ;;  %s620_s23 = sphi %s670_s23, %s915_s23   ;;  %s616_s22 = sphi %s668_s22, %s914_s22  }
  0x12   : > { %s693_s27 = sadd.s32 1, %s628_s25   ;;  %s71_s28 = sadd.s32 1, %s624_s24 }
  0x13   : > { %s68_s29 = ssub.s32 %s628_s25, %s693_s27  ;;  %p81_p3 = scmp.ne.s32.totalorder %s624_s24, %s620_s23 }
  0x14   : > { %p69_p4 = scmp.eq.s32.totalorder %s68_s29, 0  ;;  %p82_p5 = scmp.eq.s32.totalorder %s689_s0, 3 }
  0x15   : > { %p87_p6 = scmp.ne.s32.totalorder %s620_s23, %s616_s22  ;;  %p88_p7 = scmp.eq.s32.totalorder %s351_s26, 3 }
  0x16   : > { %s704_s30 = scalar_select %p69_p4, %s624_s24, %s71_s28  }
  0x17   : > { %p706_p8 = por %p82_p5, %p81_p3  ;;  %p710_p9 = por %p88_p7, %p87_p6 }
  0x18   : > { %p352_p10 = scmp.ge.s32.totalorder %s628_s25, 1  ;;  %p95_p11 = scmp.lt.s32.totalorder %s628_s25, 5 }
  0x19   : > { %s903_s4 = scalar_select %p706_p8, 1, 0 }
  0x1a   : > { %s904_s5 = scalar_select %p710_p9, 1, 0 }
  0x1b   : > { %p900_p12 = scmp.eq.s32.totalorder %s689_s0, 0  ;;  %p717_p13 = pnand %p352_p10, %p95_p11 }
  0x1c   : > { %s631_s7 = smov [#allocation4]   ;;  %s632_s10 = smov [#allocation7]  }
  0x1d   : > { %s905_s6 = scalar_select %p717_p13, 1, 0 }
  0x1e   : > { %s107_s8 = sshll.u32 %s631_s7, 4  ;;  %p437_p0 = pneg %p717_p13  ;;  %s108_s8 = int_to_ptr.vmem [resolvable:$true] %s107_s8 }
  0x1f   : > { %s120_s11 = sshll.u32 %s632_s10, 4  ;;  %s500_s14 = scalar_lea.hbm %s897_s1, 4096  ;;  %s729_s11 = int_to_ptr.vmem [resolvable:$true] %s120_s11 }
  0x20   : > { %p725_p1 = pnand %p900_p12, %p437_p0  ;;  %p501_p2 = scmp.ne.s32.totalorder %s897_s1, %s500_s14 }
  0x21   : > { %p507_p6 = scmp.lt.u32.totalorder %s500_s14, %s897_s1 }
  0x22   : > { %p502_p3 = pneg %p725_p1 }
  0x24   : > { %p503_p4 = pnand %p502_p3, %p501_p2 }
  0x26   : > { %p504_p5 = pneg %p503_p4 }
  0x28   : > { %p509_p7 = pnand %p507_p6, %p504_p5 }
  0x2a   : > { %512 = shalt.err (!%p509_p7)
}
  0x2b   : > { %s513_s19 = scalar_lea.vmem %s108_s8, 4096  ;;  %p521_p12 = scmp.lt.s32.totalorder %s108_s8, %s108_s8 }
  0x2c   : > { %p514_p10 = scmp.ne.s32.totalorder %s108_s8, %s513_s19  ;;  %p522_p9 = scmp.lt.s32.totalorder %s513_s19, %s513_s19 }
  0x2e   : > { %p516_p11 = pnand %p514_p10, %p502_p3  ;;  %p523_p8 = por %p522_p9, %p521_p12 }
  0x30   : > { %p517_p0 = pneg %p516_p11 }
  0x32   : > { %p524_p13 = pnand %p523_p8, %p517_p0 }
  0x34   : > { %527 = shalt.err (!%p524_p13)
}
  0x35   : > { %s633_s20 = smov 128   ;;  %s634_s21 = smov 8  }
  0x36   : > { %440 = dma.hbm_to_vmem [thread:$0]  (!%p725_p1), %s897_s1, 4096, %s108_s8, [#allocation5], %s633_s20, %s633_s20, %s634_s21  }
  0x37   : > { %s528_s10 = scalar_lea.hbm %s898_s2, 256 }
  0x38   : > { %p529_p2 = scmp.ne.s32.totalorder %s898_s2, %s528_s10  ;;  %p535_p12 = scmp.lt.u32.totalorder %s528_s10, %s898_s2 }
  0x3a   : > { %p531_p8 = pnand %p529_p2, %p502_p3 }
  0x3c   : > { %p532_p9 = pneg %p531_p8 }
  0x3e   : > { %p537_p13 = pnand %p535_p12, %p532_p9 }
  0x40   : > { %540 = shalt.err (!%p537_p13)
}
  0x41   : > { %s541_s8 = scalar_lea.vmem %s729_s11, 256  ;;  %p549_p7 = scmp.lt.s32.totalorder %s729_s11, %s729_s11 }
  0x42   : > { %p542_p4 = scmp.ne.s32.totalorder %s729_s11, %s541_s8  ;;  %p550_p10 = scmp.lt.s32.totalorder %s541_s8, %s541_s8 }
  0x44   : > { %p544_p5 = pnand %p542_p4, %p502_p3  ;;  %p551_p11 = por %p550_p10, %p549_p7 }
  0x46   : > { %p545_p6 = pneg %p544_p5 }
  0x48   : > { %p552_p0 = pnand %p551_p11, %p545_p6 }
  0x4a   : > { %555 = shalt.err (!%p552_p0)
}
  0x4b   : > { %443 = dma.hbm_to_vmem [thread:$0]  (!%p725_p1), %s898_s2, 256, %s729_s11, [#allocation8], %s633_s20, %s633_s20, %s634_s21  }
  0x4c   : > { %p907_p2 = scmp.ne.s32.totalorder %s905_s6, 0 }
  0x4d   : > { %p908_p8 = scmp.eq.s32.totalorder (!%p907_p2), %s689_s0, 0 }
  0x4e   : > { %136 = sbr.rel (%p907_p2) target bundleno = 148 (0x94), region = 28 }
  0x55   : > { %603 = dma.done.wait (%p908_p8), [#allocation5], 4096   ;;  %p909_p3 = pmov %p908_p8 }
  0x57   : > { %605 = vsyncadd (%p909_p3), [#allocation5], 4294963200  ;;  %p910_p9 = pmov %p909_p3 }
  0x58   : > { %p911_p12 = pmov %p909_p3 }
  0x59   : > { %607 = dma.done.wait (%p910_p9), [#allocation8], 256  }
  0x5a   : > { %609 = vsyncadd (%p911_p12), [#allocation8], 4294967040  ;;  %s154_s9 = sand.u32 1, %s620_s23   ;;  %s790_s11 = sshll.u32 %s689_s0, 3 }
  0x5b   : > { %s794_s6 = sshll.u32 %s154_s9, 3  ;;  %s360_s18 = sshll.u32 %s689_s0, 2 }
  0x5c   : > { %s161_s19 = sld [smem:[#allocation3 + %s790_s11]]  ;;  %s170_s20 = sadd.s32 1, %s790_s11 }
  0x5d   : > { %s183_s21 = sadd.s32 2, %s790_s11  ;;  %s171_s26 = sld [smem:[#allocation3 + %s170_s20]] }
  0x5e   : > { %s800_s28 = sld [smem:[#allocation3 + %s183_s21]]  ;;  %s193_s29 = sadd.s32 3, %s790_s11 }
  0x5f   : > { %s206_s7 = sadd.s32 4, %s790_s11  ;;  %s804_s10 = sld [smem:[#allocation3 + %s193_s29]] }
  0x60   : > { %s806_s12 = sld [smem:[#allocation3 + %s206_s7]]  ;;  %s216_s13 = sadd.s32 5, %s790_s11 }
  0x61   : > { %s229_s14 = sadd.s32 6, %s790_s11  ;;  %s810_s15 = sld [smem:[#allocation3 + %s216_s13]] }
  0x62   : > { %p162_p1 = scmp.gt.s32.totalorder %s161_s19, 0  ;;  %p361_p13 = scmp.lt.s32.totalorder %s161_s19, 255 }
  0x63   : > { %s812_s8 = sld [smem:[#allocation3 + %s229_s14]]  ;;  %p172_p4 = scmp.gt.s32.totalorder %s171_s26, 0 }
  0x64   : > { %s919_s19 = smov (!%p162_p1, %s161_s19), 0  ;;  %p366_p5 = scmp.lt.s32.totalorder %s171_s26, 255 }
  0x65   : > { %s921_s19 = smov (!%p361_p13, %s919_s19), 255  ;;  %s814_s16 = scalar_lea.vmem [#allocation7], %s360_s18 }
  0x66   : > { %v160_v0 = vld [vmem:[%s814_s16] sm:$0x1]  ;;  %s923_s26 = smov (!%p172_p4, %s171_s26), 0  ;;  %p185_p6 = scmp.gt.s32.totalorder %s800_s28, 0  ;;  %v372_v5 = vld [vmem:[%s814_s16 + $0x1] sm:$0x1] }
  0x67   : > { %s166_s17 = scalar_lea.vmem [#allocation4], %s921_s19  ;;  %s925_s26 = smov (!%p366_p5, %s923_s26), 255  ;;  %v384_v10 = vld [vmem:[%s814_s16 + $0x2] sm:$0x1]  ;;  %v396_v15 = vld [vmem:[%s814_s16 + $0x3] sm:$0x1] }
  0x68   : > { %v167_v1 = vld [vmem:[%s166_s17] sm:$0x1]  ;;  %s186_s20 = scalar_select %p185_p6, %s800_s28, 0 }
  0x69   : > { %v168_v2 = vadd.f32 %v167_v1, %v160_v0  ;;  %p373_p7 = scmp.lt.s32.totalorder %s800_s28, 255  ;;  %s821_s21 = scalar_lea.vmem [#allocation9], %s794_s6 }
  0x6a   : > { %s176_s18 = scalar_lea.vmem [#allocation4], %s925_s26  ;;  %p195_p10 = scmp.gt.s32.totalorder %s804_s10, 0 }
  0x6b   : > { %169 = vst [vmem:[%s821_s21] sm:$0x1] %v168_v2  ;;  %v177_v3 = vld [vmem:[%s176_s18] sm:$0x1]  ;;  %p378_p11 = scmp.lt.s32.totalorder %s804_s10, 255  ;;  %s927_s20 = smov (!%p373_p7, %s186_s20), 255 }
  0x6c   : > { %v178_v4 = vadd.f32 %v177_v3, %v160_v0  ;;  %s929_s10 = smov (!%p195_p10, %s804_s10), 0  ;;  %p208_p0 = scmp.gt.s32.totalorder %s806_s12, 0 }
  0x6d   : > { %s189_s6 = scalar_lea.vmem [#allocation4], %s927_s20  ;;  %s931_s10 = smov (!%p378_p11, %s929_s10), 255 }
  0x6e   : > { %179 = vst [vmem:[%s821_s21 + $0x1] sm:$0x1] %v178_v4  ;;  %v190_v6 = vld [vmem:[%s189_s6] sm:$0x1]  ;;  %s209_s19 = scalar_select %p208_p0, %s806_s12, 0 }
  0x6f   : > { %v191_v7 = vadd.f32 %v372_v5, %v190_v6  ;;  %p385_p2 = scmp.lt.s32.totalorder %s806_s12, 255  ;;  %s199_s26 = scalar_lea.vmem [#allocation4], %s931_s10 }
  0x70   : > { %v200_v8 = vld [vmem:[%s199_s26] sm:$0x1]  ;;  %p218_p8 = scmp.gt.s32.totalorder %s810_s15, 0  ;;  %p390_p3 = scmp.lt.s32.totalorder %s810_s15, 255 }
  0x71   : > { %192 = vst [vmem:[%s821_s21 + $0x2] sm:$0x1] %v191_v7  ;;  %v201_v9 = vadd.f32 %v372_v5, %v200_v8  ;;  %s933_s19 = smov (!%p385_p2, %s209_s19), 255  ;;  %p231_p9 = scmp.gt.s32.totalorder %s812_s8, 0 }
  0x72   : > { %s935_s15 = smov (!%p218_p8, %s810_s15), 0  ;;  %s212_s28 = scalar_lea.vmem [#allocation4], %s933_s19 }
  0x73   : > { %202 = vst [vmem:[%s821_s21 + $0x3] sm:$0x1] %v201_v9  ;;  %v213_v11 = vld [vmem:[%s212_s28] sm:$0x1]  ;;  %s937_s15 = smov (!%p390_p3, %s935_s15), 255  ;;  %p397_p12 = scmp.lt.s32.totalorder %s812_s8, 255 }
  0x74   : > { %v214_v12 = vadd.f32 %v384_v10, %v213_v11  ;;  %s232_s29 = scalar_select %p231_p9, %s812_s8, 0 }
  0x75   : > { %s222_s7 = scalar_lea.vmem [#allocation4], %s937_s15  ;;  %s239_s10 = sadd.s32 7, %s790_s11 }
  0x76   : > { %215 = vst [vmem:[%s821_s21 + $0x4] sm:$0x1] %v214_v12  ;;  %v223_v13 = vld [vmem:[%s222_s7] sm:$0x1]  ;;  %s939_s29 = smov (!%p397_p12, %s232_s29), 255  ;;  %s240_s12 = sld [smem:[#allocation3 + %s239_s10]] }
  0x77   : > { %v224_v14 = vadd.f32 %v384_v10, %v223_v13  ;;  %s235_s13 = scalar_lea.vmem [#allocation4], %s939_s29  ;;  %s408_s14 = sshll.u32 %s689_s0, 7 }
  0x78   : > { %v236_v16 = vld [vmem:[%s235_s13] sm:$0x1]  ;;  %s263_s15 = sshll.u32 %s821_s21, 4  ;;  %s851_s17 = scalar_lea.hbm %s899_s3, %s408_s14  ;;  %s853_s15 = int_to_ptr.vmem [resolvable:$true] %s263_s15 }
  0x79   : > { %225 = vst [vmem:[%s821_s21 + $0x5] sm:$0x1] %v224_v14  ;;  %v237_v17 = vadd.f32 %v396_v15, %v236_v16  ;;  %s250_s20 = scalar_lea.sflag [#allocation6], %s154_s9  ;;  %s556_s18 = scalar_lea.vmem %s853_s15, 128 }
  0x7a   : > { %p557_p4 = scmp.ne.s32.totalorder %s853_s15, %s556_s18  ;;  %p912_p5 = scmp.ne.s32.totalorder %s903_s4, 0 }
  0x7b   : > { %238 = vst [vmem:[%s821_s21 + $0x6] sm:$0x1] %v237_v17  ;;  %s635_s0 = smov [#allocation9]  }
  0x7c   : > { %p241_p1 = scmp.gt.s32.totalorder %s240_s12, 0  ;;  %p402_p13 = scmp.lt.s32.totalorder %s240_s12, 255 }
  0x7d   : > { %p558_p6 = pnand %p557_p4, %p912_p5  ;;  %s560_s6 = sshll.u32 %s635_s0, 4  ;;  %s561_s6 = int_to_ptr.vmem [resolvable:$false] %s560_s6 }
  0x7e   : > { %s941_s12 = smov (!%p241_p1, %s240_s12), 0  ;;  %s562_s19 = scalar_lea.vmem %s561_s6, 256 }
  0x7f   : > { %s943_s12 = smov (!%p402_p13, %s941_s12), 255  ;;  %p559_p7 = pneg %p558_p6 }
  0x80   : > { %s245_s8 = scalar_lea.vmem [#allocation4], %s943_s12  ;;  %p563_p10 = scmp.lt.s32.totalorder %s853_s15, %s561_s6 }
  0x81   : > { %v246_v18 = vld [vmem:[%s245_s8] sm:$0x1]  ;;  %p564_p11 = scmp.lt.s32.totalorder %s562_s19, %s556_s18 }
  0x82   : > { %v247_v19 = vadd.f32 %v396_v15, %v246_v18 }
  0x83   : > { %p565_p0 = por %p564_p11, %p563_p10 }
  0x84   : > { %248 = vst [vmem:[%s821_s21 + $0x7] sm:$0x1] %v247_v19 }
  0x85   : > { %p566_p2 = pnand %p565_p0, %p559_p7 }
  0x87   : > { %569 = shalt.err (!%p566_p2)
}
  0x88   : > { %s570_s9 = scalar_lea.hbm %s851_s17, 128  ;;  %s574_s28 = scalar_lea.hbm %s899_s3, 512 }
  0x89   : > { %p571_p8 = scmp.ne.s32.totalorder %s851_s17, %s570_s9  ;;  %p575_p12 = scmp.lt.u32.totalorder %s851_s17, %s899_s3 }
  0x8a   : > { %p576_p1 = scmp.lt.u32.totalorder %s574_s28, %s570_s9  ;;  %p578_p4 = scmp.lt.u32.totalorder %s570_s9, %s851_s17 }
  0x8b   : > { %p572_p3 = pnand %p571_p8, %p912_p5 }
  0x8c   : > { %p577_p13 = por %p576_p1, %p575_p12 }
  0x8d   : > { %p573_p9 = pneg %p572_p3 }
  0x8e   : > { %p579_p6 = por %p578_p4, %p577_p13 }
  0x90   : > { %p580_p7 = pnand %p579_p6, %p573_p9 }
  0x92   : > { %583 = shalt.err (!%p580_p7)
}
  0x93   : > { %435 = dma.vmem_to_hbm [thread:$0]  (%p912_p5), %s853_s15, 128, %s851_s17, %s250_s20  }
  0x94 PF: > { %p452_p10 = scmp.ge.s32.totalorder %s628_s25, 2  ;;  %s275_s10 = sand.u32 1, %s616_s22  }
  0x95   : > { %p913_p11 = scmp.ne.s32.totalorder %s904_s5, 0  ;;  %s276_s12 = scalar_lea.sflag [#allocation6], %s275_s10 }
  0x97   : > { %p445_p0 = pnand %p452_p10, %p913_p11 }
  0x99   : > { %611 = dma.done.wait (!%p445_p0), %s276_s12, 128  }
  0x9a   : > { %613 = vsyncadd (!%p445_p0), %s276_s12, 4294967168  ;;  %p19_p2 = scmp.ge.s32.totalorder %s693_s27, 6   ;;  %s914_s22 = smov %s620_s23 }
  0x9b   : > { %s915_s23 = smov %s624_s24  ;;  %s916_s24 = smov %s704_s30 }
  0x9c   : > { %s917_s25 = smov %s693_s27  ;;  %21 = sbr.rel (!%p19_p2) target bundleno = 17 (0x11), region = 81 }
  0xa3   :  { %281 = vsyncpa [#allocation5], 1 }
  0xa4   :  { %283 = vsyncpa [#allocation5 + $0x1], 1 }
  0xa5   :  { %284 = vsyncpa [#allocation8], 1 }
  0xa6   :  { %285 = vsyncpa [#allocation6], 1 }
  0xa7   :  { %287 = vsyncpa [#allocation6 + $0x1], 1 }

</bundles_post_ra>
